<compile_context>
chip_gen: v7x
topology: tpu7x:2x2x1
jax: 0.10.0
libtpu: 0.0.40
codegen_flags: <defaults>
</compile_context>

<pallas_src>
import jax
import jax.numpy as jnp
from jax.experimental import pallas as pl
from jax.experimental.pallas import tpu as pltpu

_MAX_TM = 2048  # rows; >=512-1024 rows already sits at ~85-86% of HBM roofline


def _lora_kernel(alpha_ref, x_ref, wa_ref, wb_ref, o_ref):
    # (tm, in_dim) @ (in_dim, rank) -> (tm, rank), f32 accumulation on the MXU.
    xa = jnp.dot(x_ref[...], wa_ref[...], preferred_element_type=jnp.float32)
    # Scale the tiny (tm, rank) intermediate (VPU work ~ rank, not out_dim),
    # then (tm, rank) @ (rank, out_dim) -> (tm, out_dim).
    y = jnp.dot(alpha_ref[0] * xa, wb_ref[...], preferred_element_type=jnp.float32)
    o_ref[...] = y.astype(o_ref.dtype)


def _hw_params():
    """Generation-aware (data_budget, vmem_limit_cap, num_tensorcores)."""
    vmem_cap = 64 << 20  # conservative default: v7x per-TC VMEM
    num_tc = 1
    try:
        info = pltpu.get_tpu_info()
        vmem_cap = int(getattr(info, "vmem_capacity_bytes", vmem_cap))
        for name in ("num_cores", "tensorcores_per_chip", "num_tensorcores"):
            val = getattr(info, name, None)
            if val:
                num_tc = int(val)
                break
        else:
            # 64 MiB per-TC VMEM is the v7x signature -> 2 TensorCores / chip.
            if vmem_cap <= (64 << 20):
                num_tc = 2
    except Exception:
        pass  # query unavailable (e.g. interpret mode): keep conservative defaults
    if vmem_cap >= (96 << 20):                 # v5e / v6e: 128 MiB per core
        vmem_limit_cap = vmem_cap - (28 << 20)  # ~100 MiB
    else:                                      # v7x: 64 MiB per core
        vmem_limit_cap = vmem_cap - (8 << 20)   # ~56 MiB
    data_budget = min(88 << 20, vmem_limit_cap - (16 << 20))
    return data_budget, vmem_limit_cap, num_tc


def _choose_tm(m, per_row_bytes, weight_bytes, data_budget_bytes, num_tc):
    """Row-tile size from a VMEM budget; optional 2-way split on 2-TC chips."""
    m8 = -(-m // 8) * 8
    avail = max(data_budget_bytes - weight_bytes, 8 * per_row_bytes)
    tm = int(avail // max(per_row_bytes, 1))
    tm = max(8, min(tm, _MAX_TM))
    tm = (tm // 8) * 8  # sublane-aligned (the (8,128) block constraint)
    if tm >= m8:
        if num_tc >= 2 and m8 >= 1024:
            # Two TensorCores share the "parallel" grid axis and each half
            # stays above the ~512-row bandwidth knee -> split is a net win.
            tm = -(-(m8 // 2) // 8) * 8
        else:
            # Single full-size tile, exactly M rows (no padding, no partial
            # block, no extra serial grid step on single-TC chips).
            tm = m
    return tm


def lora_forward(x, w_a, w_b, alpha, *, tm=None):
    """x: (..., in_dim) -> (..., out_dim), y = alpha * (x @ w_a @ w_b)."""
    in_dim, rank = w_a.shape
    rank_b, out_dim = w_b.shape
    assert rank == rank_b and x.shape[-1] == in_dim

    lead_shape = x.shape[:-1]
    x2d = x.reshape(-1, in_dim)
    m = x2d.shape[0]
    out_dtype = x.dtype

    # Lane-dense output stores: pad W_b's out_dim up to a multiple of 128
    # (tiny, one-time) so the kernel writes unmasked full-lane vst's.
    out_p = -(-out_dim // 128) * 128
    if out_p != out_dim:
        w_b = jnp.pad(w_b, ((0, 0), (0, out_p - out_dim)))

    in_itemsize = jnp.dtype(x.dtype).itemsize
    out_itemsize = jnp.dtype(out_dtype).itemsize
    w_itemsize = jnp.dtype(w_a.dtype).itemsize
    f32 = 4
    rank_lanes = -(-rank // 128) * 128

    # Per-row VMEM footprint: double-buffered x and y row tiles plus in-kernel
    # f32 temporaries (lane-padded (tm, rank) intermediate; pre-cast f32 result
    # when the output dtype is narrower than f32).
    per_row = 2 * in_dim * in_itemsize + 2 * out_p * out_itemsize + rank_lanes * f32
    if out_dtype != jnp.float32:
        per_row += out_p * f32
    # Conservative (double-buffered) weight footprint.
    weight_bytes = 2 * (in_dim * rank + rank * out_p) * w_itemsize

    data_budget, vmem_limit_cap, num_tc = _hw_params()

    if tm is None:
        tm = _choose_tm(m, per_row, weight_bytes, data_budget, num_tc)
    else:
        tm = int(tm)
        if tm != m:
            tm = max(8, -(-tm // 8) * 8)

    num_tiles = pl.cdiv(m, tm)
    vmem_needed = tm * per_row + weight_bytes
    vmem_limit = int(
        min(max(vmem_needed + vmem_needed // 4 + (4 << 20), 16 << 20), vmem_limit_cap)
    )

    cost = pl.CostEstimate(
        flops=2 * m * rank * (in_dim + out_p),
        transcendentals=0,
        bytes_accessed=(
            m * (in_dim * in_itemsize + out_p * out_itemsize)
            + (in_dim * rank + rank * out_p) * w_itemsize
        ),
    )

    alpha_arr = jnp.asarray(alpha, dtype=jnp.float32).reshape((1,))

    def run(single_buffer_weights):
        # Weights have a constant index_map (never re-DMA'd across the grid);
        # single-buffer them to hand their second VMEM buffer back to the rows.
        w_kwargs = {"pipeline_mode": pl.Buffered(1)} if single_buffer_weights else {}
        grid_spec = pltpu.PrefetchScalarGridSpec(
            num_scalar_prefetch=1,  # alpha -> f32 scalar in SMEM
            grid=(num_tiles,),
            in_specs=[
                pl.BlockSpec((tm, in_dim), lambda i, a: (i, 0)),
                pl.BlockSpec((in_dim, rank), lambda i, a: (0, 0), **w_kwargs),
                pl.BlockSpec((rank, out_p), lambda i, a: (0, 0), **w_kwargs),
            ],
            out_specs=pl.BlockSpec((tm, out_p), lambda i, a: (i, 0)),
        )
        return pl.pallas_call(
            _lora_kernel,
            out_shape=jax.ShapeDtypeStruct((m, out_p), out_dtype),
            grid_spec=grid_spec,
            compiler_params=pltpu.CompilerParams(
                dimension_semantics=("parallel",),
                vmem_limit_bytes=vmem_limit,
            ),
            cost_estimate=cost,
        )(alpha_arr, x2d, w_a, w_b)

    try:
        y2d = run(single_buffer_weights=True)
    except Exception:
        # Graceful fallback if this JAX build rejects pipeline_mode=Buffered(1).
        y2d = run(single_buffer_weights=False)

    if out_p != out_dim:
        y2d = y2d[:, :out_dim]
    return y2d.reshape(*lead_shape, out_dim)


if __name__ == "__main__":
    # --- Primary check: small shapes consistent with the module ------------
    batch, seq, in_dim, out_dim, rank, alpha = 2, 8, 32, 32, 4, 4.0

    key = jax.random.PRNGKey(0)
    kx, ka, kx2, ka2, kb2, kx3 = jax.random.split(key, 6)

    x = jax.random.normal(kx, (batch, seq, in_dim), dtype=jnp.float32)

    # Parameter init mirroring the PyTorch __init__:
    std_dev = 1.0 / jnp.sqrt(jnp.float32(rank))
    w_a = jax.random.normal(ka, (in_dim, rank), dtype=jnp.float32) * std_dev
    w_b = jnp.zeros((rank, out_dim), dtype=jnp.float32)  # zeros, as in the module

    y = jax.block_until_ready(lora_forward(x, w_a, w_b, alpha))
    y_ref = alpha * (x @ w_a @ w_b)
    assert y.shape == (batch, seq, out_dim)
    assert jnp.allclose(y, y_ref, atol=1e-5, rtol=1e-5)

    # --- Secondary check: non-divisible row count (m=150) with an explicit
    #     small tile -> exercises the partial final block (no wrapper pad) ---
    b2, s2, d_in2, d_out2, r2, a2 = 3, 50, 256, 256, 8, 2.0
    x2 = jax.random.normal(kx2, (b2, s2, d_in2), dtype=jnp.float32)
    wa2 = jax.random.normal(ka2, (d_in2, r2), dtype=jnp.float32) / jnp.sqrt(
        jnp.float32(r2)
    )
    wb2 = jax.random.normal(kb2, (r2, d_out2), dtype=jnp.float32) * 0.02
    y2 = jax.block_until_ready(lora_forward(x2, wa2, wb2, a2, tm=64))
    y2_ref = a2 * (x2 @ wa2 @ wb2)
    assert y2.shape == (b2, s2, d_out2)
    assert jnp.allclose(y2, y2_ref, atol=1e-4, rtol=1e-4)

    # --- bf16 path (auto tile size; f32 accumulation inside the kernel) ----
    x3 = jax.random.normal(kx3, (b2, s2, d_in2), dtype=jnp.float32)
    y3 = jax.block_until_ready(
        lora_forward(
            x3.astype(jnp.bfloat16),
            wa2.astype(jnp.bfloat16),
            wb2.astype(jnp.bfloat16),
            a2,
        )
    )
    y3_ref = a2 * (x3 @ wa2 @ wb2)
    assert y3.dtype == jnp.bfloat16
    assert jnp.allclose(y3.astype(jnp.float32), y3_ref, atol=0.1, rtol=0.1)

    print("KERNEL_OK")
</pallas_src>

<mosaic_0001>
module attributes {stable_mosaic.version = 11 : i64} {
  func.func @_lora_kernel(%arg0: i32, %arg1: memref<1xf32, #tpu.memory_space<smem>>, %arg2: memref<16x32xf32, #tpu.memory_space<vmem>>, %arg3: memref<32x4xf32, #tpu.memory_space<vmem>>, %arg4: memref<4x128xf32, #tpu.memory_space<vmem>>, %arg5: memref<16x128xf32, #tpu.memory_space<vmem>>) attributes {dimension_semantics = [#tpu.dimension_semantics<parallel>], iteration_bounds = array<i64: 1>, scalar_prefetch = 1 : i64, scratch_operands = 0 : i64, tpu.core_type = #tpu.core_type<tc>, window_params = [{transform_indices = @transform_0, window_bounds = array<i64: 16, 32>}, {pipeline_mode = #tpu.pipeline_mode<synchronous>, transform_indices = @transform_1, window_bounds = array<i64: 32, 4>}, {pipeline_mode = #tpu.pipeline_mode<synchronous>, transform_indices = @transform_2, window_bounds = array<i64: 4, 128>}, {transform_indices = @transform_3, window_bounds = array<i64: 16, 128>}]} {
    %c0 = arith.constant 0 : index
    %c0_0 = arith.constant 0 : index
    %0 = vector.load %arg2[%c0, %c0_0] : memref<16x32xf32, #tpu.memory_space<vmem>>, vector<16x32xf32>
    %c0_1 = arith.constant 0 : index
    %c0_2 = arith.constant 0 : index
    %1 = vector.load %arg3[%c0_1, %c0_2] : memref<32x4xf32, #tpu.memory_space<vmem>>, vector<32x4xf32>
    %cst = arith.constant dense<0.000000e+00> : vector<16x4xf32>
    %2 = tpu.matmul %0, %1, %cst {dimension_numbers = #tpu.dot_dimension_numbers<[1], [0], [0], [1], [0, 0, 1, 1], [], []>} : vector<16x32xf32>, vector<32x4xf32>, vector<16x4xf32> -> vector<16x4xf32>
    %c0_3 = arith.constant 0 : index
    %3 = memref.load %arg1[%c0_3] : memref<1xf32, #tpu.memory_space<smem>>
    %4 = vector.broadcast %3 : f32 to vector<16x4xf32>
    %5 = arith.mulf %4, %2 : vector<16x4xf32>
    %c0_4 = arith.constant 0 : index
    %c0_5 = arith.constant 0 : index
    %6 = vector.load %arg4[%c0_4, %c0_5] : memref<4x128xf32, #tpu.memory_space<vmem>>, vector<4x128xf32>
    %cst_6 = arith.constant dense<0.000000e+00> : vector<16x128xf32>
    %7 = tpu.matmul %5, %6, %cst_6 {dimension_numbers = #tpu.dot_dimension_numbers<[1], [0], [0], [1], [0, 0, 1, 1], [], []>} : vector<16x4xf32>, vector<4x128xf32>, vector<16x128xf32> -> vector<16x128xf32>
    %c0_7 = arith.constant 0 : index
    %c0_8 = arith.constant 0 : index
    %8 = vector.load %arg5[%c0_7, %c0_8] : memref<16x128xf32, #tpu.memory_space<vmem>>, vector<16x128xf32>
    tpu.vector_store %arg5[%c0_7, %c0_8], %7 {strides = array<i32>} : memref<16x128xf32, #tpu.memory_space<vmem>>, vector<16x128xf32>,
    return
  }
  func.func @transform_0(%arg0: i32, %arg1: memref<1xf32, #tpu.memory_space<smem>>) -> (i32, i32) {
    %c0_i32 = arith.constant 0 : i32
    %c0_i32_0 = arith.constant 0 : i32
    return %arg0, %c0_i32 : i32, i32
  }
  func.func @transform_1(%arg0: i32, %arg1: memref<1xf32, #tpu.memory_space<smem>>) -> (i32, i32) {
    %c0_i32 = arith.constant 0 : i32
    %c0_i32_0 = arith.constant 0 : i32
    %c0_i32_1 = arith.constant 0 : i32
    return %c0_i32, %c0_i32_0 : i32, i32
  }
  func.func @transform_2(%arg0: i32, %arg1: memref<1xf32, #tpu.memory_space<smem>>) -> (i32, i32) {
    %c0_i32 = arith.constant 0 : i32
    %c0_i32_0 = arith.constant 0 : i32
    %c0_i32_1 = arith.constant 0 : i32
    return %c0_i32, %c0_i32_0 : i32, i32
  }
  func.func @transform_3(%arg0: i32, %arg1: memref<1xf32, #tpu.memory_space<smem>>) -> (i32, i32) {
    %c0_i32 = arith.constant 0 : i32
    %c0_i32_0 = arith.constant 0 : i32
    return %arg0, %c0_i32 : i32, i32
  }
}

module attributes {stable_mosaic.version = 11 : i64} {
  func.func @_lora_kernel(%arg0: i32, %arg1: memref<1xf32, #tpu.memory_space<smem>>, %arg2: memref<16x32xf32, #tpu.memory_space<vmem>>, %arg3: memref<32x4xf32, #tpu.memory_space<vmem>>, %arg4: memref<4x128xf32, #tpu.memory_space<vmem>>, %arg5: memref<16x128xf32, #tpu.memory_space<vmem>>) attributes {dimension_semantics = [#tpu.dimension_semantics<parallel>], iteration_bounds = array<i64: 1>, scalar_prefetch = 1 : i64, scratch_operands = 0 : i64, tpu.core_type = #tpu.core_type<tc>, window_params = [{transform_indices = @transform_0, window_bounds = array<i64: 16, 32>}, {pipeline_mode = #tpu.pipeline_mode<synchronous>, transform_indices = @transform_1, window_bounds = array<i64: 32, 4>}, {pipeline_mode = #tpu.pipeline_mode<synchronous>, transform_indices = @transform_2, window_bounds = array<i64: 4, 128>}, {transform_indices = @transform_3, window_bounds = array<i64: 16, 128>}]} {
    %c0 = arith.constant 0 : index
    %c0_0 = arith.constant 0 : index
    %0 = vector.load %arg2[%c0, %c0_0] : memref<16x32xf32, #tpu.memory_space<vmem>>, vector<16x32xf32>
    %c0_1 = arith.constant 0 : index
    %c0_2 = arith.constant 0 : index
    %1 = vector.load %arg3[%c0_1, %c0_2] : memref<32x4xf32, #tpu.memory_space<vmem>>, vector<32x4xf32>
    %cst = arith.constant dense<0.000000e+00> : vector<16x4xf32>
    %2 = tpu.matmul %0, %1, %cst {dimension_numbers = #tpu.dot_dimension_numbers<[1], [0], [0], [1], [0, 0, 1, 1], [], []>} : vector<16x32xf32>, vector<32x4xf32>, vector<16x4xf32> -> vector<16x4xf32>
    %c0_3 = arith.constant 0 : index
    %3 = memref.load %arg1[%c0_3] : memref<1xf32, #tpu.memory_space<smem>>
    %4 = vector.broadcast %3 : f32 to vector<16x4xf32>
    %5 = arith.mulf %4, %2 : vector<16x4xf32>
    %c0_4 = arith.constant 0 : index
    %c0_5 = arith.constant 0 : index
    %6 = vector.load %arg4[%c0_4, %c0_5] : memref<4x128xf32, #tpu.memory_space<vmem>>, vector<4x128xf32>
    %cst_6 = arith.constant dense<0.000000e+00> : vector<16x128xf32>
    %7 = tpu.matmul %5, %6, %cst_6 {dimension_numbers = #tpu.dot_dimension_numbers<[1], [0], [0], [1], [0, 0, 1, 1], [], []>} : vector<16x4xf32>, vector<4x128xf32>, vector<16x128xf32> -> vector<16x128xf32>
    %c0_7 = arith.constant 0 : index
    %c0_8 = arith.constant 0 : index
    %8 = vector.load %arg5[%c0_7, %c0_8] : memref<16x128xf32, #tpu.memory_space<vmem>>, vector<16x128xf32>
    tpu.vector_store %arg5[%c0_7, %c0_8], %7 {strides = array<i32>} : memref<16x128xf32, #tpu.memory_space<vmem>>, vector<16x128xf32>,
    return
  }
  func.func @transform_0(%arg0: i32, %arg1: memref<1xf32, #tpu.memory_space<smem>>) -> (i32, i32) {
    %c0_i32 = arith.constant 0 : i32
    %c0_i32_0 = arith.constant 0 : i32
    return %arg0, %c0_i32 : i32, i32
  }
  func.func @transform_1(%arg0: i32, %arg1: memref<1xf32, #tpu.memory_space<smem>>) -> (i32, i32) {
    %c0_i32 = arith.constant 0 : i32
    %c0_i32_0 = arith.constant 0 : i32
    %c0_i32_1 = arith.constant 0 : i32
    return %c0_i32, %c0_i32_0 : i32, i32
  }
  func.func @transform_2(%arg0: i32, %arg1: memref<1xf32, #tpu.memory_space<smem>>) -> (i32, i32) {
    %c0_i32 = arith.constant 0 : i32
    %c0_i32_0 = arith.constant 0 : i32
    %c0_i32_1 = arith.constant 0 : i32
    return %c0_i32, %c0_i32_0 : i32, i32
  }
  func.func @transform_3(%arg0: i32, %arg1: memref<1xf32, #tpu.memory_space<smem>>) -> (i32, i32) {
    %c0_i32 = arith.constant 0 : i32
    %c0_i32_0 = arith.constant 0 : i32
    return %arg0, %c0_i32 : i32, i32
  }
}

</mosaic_0001>

<bundles_post_ra>
// kernel: tpu_custom_call.1
= control target key start
LH: loop header
LB: loop body
LE: loop exit
PB: predicated region body
PF: predicated region fallthrough
CT: control target
= control target key end

     0   :  { %vm23_vm0 = vcmask 261120   ;;  %s343_s0 = inlined_call_operand.<no memory space> [shape: f32[1], index: 0, kind: input, shape index: {}]   ;;  %s344_s1 = inlined_call_operand.vmem [shape: f32[16,32], index: 1, kind: input, shape index: {}]   ;;  %s345_s2 = inlined_call_operand.vmem [shape: f32[32,4], index: 2, kind: input, shape index: {}]   ;;  %s346_s3 = inlined_call_operand.vmem [shape: f32[4,128], index: 3, kind: input, shape index: {}]   ;;  %s347_s4 = inlined_call_operand.hbm [shape: f32[16,128], index: 4, kind: output, shape index: {}]  }
   0x1   :  { %v19_v0 = vld [vmem:[%s345_s2] sm:$0xff]  ;;  %v20_v1 = vld [vmem:[%s345_s2 + $0x8] sm:$0xff]  ;;  %v21_v2 = vld [vmem:[%s345_s2 + $0x10] sm:$0xff] }
   0x2   :  { %v244_v3 = vpack.c.bf16 %v20_v1, %v19_v0  ;;  %v22_v4 = vld [vmem:[%s345_s2 + $0x18] sm:$0xff]  ;;  %v17_v5 = vld [vmem:[%s344_s1] sm:$0xff] }
   0x3   :  { %v248_v6 = vpack.c.bf16 %v22_v4, %v21_v2  ;;  %236 = vmatprep.mubr.msk.f32.mxu0 %vm23_vm0, %v17_v5 }
   0x4   :  { %10 = vsyncpa [#allocation5], 0  ;;  %245 = vmatprep.subr.bf16.mxu0 %v244_v3  ;;  %v18_v7 = vld [vmem:[%s344_s1 + $0x8] sm:$0xff]  ;;  %v109_v8 = vld [vmem:[%s346_s3] sm:$0xf]  ;;  %vm117_vm1 = vcmask 1043456   ;;  %v106_v9 = vstv %s343_s0 }
   0x5   :  { %247 = vmatpush3.bf16.msra.mxu0 %v244_v3  ;;  %239 = vmatprep.subr.msk.mxu1 %vm117_vm1, %v109_v8  ;;  %vm110_vm2 = vcmask 31744   ;;  %s279_s1 = smov [#allocation4]  }
   0x6   :  { %249 = vmatprep.subr.bf16.mxu0 %v248_v6  ;;  %240 = vmatpush3.msk.msra.mxu1 %vm117_vm1, %v109_v8  ;;  %s203_s30 = sshll.u32 %s279_s1, 4  ;;  %s204_s30 = int_to_ptr.vmem [resolvable:$true] %s203_s30 }
   0x7   :  { %s255_s3 = scalar_lea.vmem %s204_s30, 256  ;;  %p260_p1 = scmp.lt.s32.totalorder %s204_s30, %s204_s30 }
   0x8   :  { %p256_p0 = scmp.ne.s32.totalorder %s204_s30, %s255_s3  ;;  %p261_p2 = scmp.lt.s32.totalorder %s255_s3, %s255_s3 }
   0x9   :  { %251 = vmatpush3.bf16.msra.mxu0 %v248_v6 }
   0xa   :  { %p262_p3 = por %p261_p2, %p260_p1 }
   0xc   :  { %237 = vmatmul.mubr.msk.f32.vlgmr.msra.gmra.mrb[0].mxu0 %vm23_vm0, %v18_v7  ;;  %p263_p4 = pnand %p262_p3, %p256_p0 }
  0xdf   :  { %v238_v10 = vpop.f32.mrb[0].mxu0 }
  0xe0   :  { %v96_v11 = vpop.f32.mrb[1].mxu0  ;;  %v108_v13 = vmul.f32 %v238_v10, %v106_v9 }
  0xe1   :  { %v107_v12 = vmul.f32 %v106_v9, %v96_v11 }
  0xe3   :  { %241 = vmatprep.mubr.msk.f32.mxu1 %vm110_vm2, %v107_v12 }
  0xe4   :  { %242 = vmatmul.mubr.msk.f32.vlgmr.msra.gmra.mrb[0].mxu1 %vm110_vm2, %v108_v13 }
 0x1b7   :  { %v243_v14 = vpop.f32.mrb[0].mxu1 }
 0x1b8   :  { %197 = vst [vmem:[#allocation4 + $0x8] sm:$0xff] %v243_v14  ;;  %v187_v15 = vpop.f32.mrb[1].mxu1 }
 0x1b9   :  { %196 = vst [vmem:[#allocation4] sm:$0xff] %v187_v15 }
 0x1ba   :  { %266 = shalt.err (!%p263_p4)
}
 0x1bb   :  { %s267_s6 = scalar_lea.hbm %s347_s4, 256 }
 0x1bc   :  { %p268_p5 = scmp.ne.s32.totalorder %s347_s4, %s267_s6  ;;  %p271_p6 = scmp.lt.u32.totalorder %s267_s6, %s347_s4 }
 0x1be   :  { %p273_p7 = pnand %p271_p6, %p268_p5 }
 0x1c0   :  { %276 = shalt.err (!%p273_p7)
}
 0x1c1   :  { %s280_s11 = smov 128   ;;  %s281_s12 = smov 8  }
 0x1c2   :  { %209 = dma.vmem_to_hbm [thread:$0]  %s204_s30, 256, %s347_s4, [#allocation5], %s280_s11, %s280_s11, %s281_s12  }
 0x1c3   :  { %277 = dma.done.wait [#allocation5], 256  }
 0x1c4   :  { %278 = vsyncadd [#allocation5], 4294967040 }
 0x1c5   :  { %213 = vsyncpa [#allocation5], 1 }

// kernel: tpu_custom_call.1
= control target key start
LH: loop header
LB: loop body
LE: loop exit
PB: predicated region body
PF: predicated region fallthrough
CT: control target
= control target key end

     0   :  { %vm23_vm0 = vcmask 261120   ;;  %s343_s0 = inlined_call_operand.<no memory space> [shape: f32[1], index: 0, kind: input, shape index: {}]   ;;  %s344_s1 = inlined_call_operand.vmem [shape: f32[16,32], index: 1, kind: input, shape index: {}]   ;;  %s345_s2 = inlined_call_operand.vmem [shape: f32[32,4], index: 2, kind: input, shape index: {}]   ;;  %s346_s3 = inlined_call_operand.vmem [shape: f32[4,128], index: 3, kind: input, shape index: {}]   ;;  %s347_s4 = inlined_call_operand.hbm [shape: f32[16,128], index: 4, kind: output, shape index: {}]  }
   0x1   :  { %v19_v0 = vld [vmem:[%s345_s2] sm:$0xff]  ;;  %v20_v1 = vld [vmem:[%s345_s2 + $0x8] sm:$0xff]  ;;  %v21_v2 = vld [vmem:[%s345_s2 + $0x10] sm:$0xff] }
   0x2   :  { %v244_v3 = vpack.c.bf16 %v20_v1, %v19_v0  ;;  %v22_v4 = vld [vmem:[%s345_s2 + $0x18] sm:$0xff]  ;;  %v17_v5 = vld [vmem:[%s344_s1] sm:$0xff] }
   0x3   :  { %v248_v6 = vpack.c.bf16 %v22_v4, %v21_v2  ;;  %236 = vmatprep.mubr.msk.f32.mxu0 %vm23_vm0, %v17_v5 }
   0x4   :  { %10 = vsyncpa [#allocation5], 0  ;;  %245 = vmatprep.subr.bf16.mxu0 %v244_v3  ;;  %v18_v7 = vld [vmem:[%s344_s1 + $0x8] sm:$0xff]  ;;  %v109_v8 = vld [vmem:[%s346_s3] sm:$0xf]  ;;  %vm117_vm1 = vcmask 1043456   ;;  %v106_v9 = vstv %s343_s0 }
   0x5   :  { %247 = vmatpush3.bf16.msra.mxu0 %v244_v3  ;;  %239 = vmatprep.subr.msk.mxu1 %vm117_vm1, %v109_v8  ;;  %vm110_vm2 = vcmask 31744   ;;  %s279_s1 = smov [#allocation4]  }
   0x6   :  { %249 = vmatprep.subr.bf16.mxu0 %v248_v6  ;;  %240 = vmatpush3.msk.msra.mxu1 %vm117_vm1, %v109_v8  ;;  %s203_s30 = sshll.u32 %s279_s1, 4  ;;  %s204_s30 = int_to_ptr.vmem [resolvable:$true] %s203_s30 }
   0x7   :  { %s255_s3 = scalar_lea.vmem %s204_s30, 256  ;;  %p260_p1 = scmp.lt.s32.totalorder %s204_s30, %s204_s30 }
   0x8   :  { %p256_p0 = scmp.ne.s32.totalorder %s204_s30, %s255_s3  ;;  %p261_p2 = scmp.lt.s32.totalorder %s255_s3, %s255_s3 }
   0x9   :  { %251 = vmatpush3.bf16.msra.mxu0 %v248_v6 }
   0xa   :  { %p262_p3 = por %p261_p2, %p260_p1 }
   0xc   :  { %237 = vmatmul.mubr.msk.f32.vlgmr.msra.gmra.mrb[0].mxu0 %vm23_vm0, %v18_v7  ;;  %p263_p4 = pnand %p262_p3, %p256_p0 }
  0xdf   :  { %v238_v10 = vpop.f32.mrb[0].mxu0 }
  0xe0   :  { %v96_v11 = vpop.f32.mrb[1].mxu0  ;;  %v108_v13 = vmul.f32 %v238_v10, %v106_v9 }
  0xe1   :  { %v107_v12 = vmul.f32 %v106_v9, %v96_v11 }
  0xe3   :  { %241 = vmatprep.mubr.msk.f32.mxu1 %vm110_vm2, %v107_v12 }
  0xe4   :  { %242 = vmatmul.mubr.msk.f32.vlgmr.msra.gmra.mrb[0].mxu1 %vm110_vm2, %v108_v13 }
 0x1b7   :  { %v243_v14 = vpop.f32.mrb[0].mxu1 }
 0x1b8   :  { %197 = vst [vmem:[#allocation4 + $0x8] sm:$0xff] %v243_v14  ;;  %v187_v15 = vpop.f32.mrb[1].mxu1 }
 0x1b9   :  { %196 = vst [vmem:[#allocation4] sm:$0xff] %v187_v15 }
 0x1ba   :  { %266 = shalt.err (!%p263_p4)
}
 0x1bb   :  { %s267_s6 = scalar_lea.hbm %s347_s4, 256 }
 0x1bc   :  { %p268_p5 = scmp.ne.s32.totalorder %s347_s4, %s267_s6  ;;  %p271_p6 = scmp.lt.u32.totalorder %s267_s6, %s347_s4 }
 0x1be   :  { %p273_p7 = pnand %p271_p6, %p268_p5 }
 0x1c0   :  { %276 = shalt.err (!%p273_p7)
}
 0x1c1   :  { %s280_s11 = smov 128   ;;  %s281_s12 = smov 8  }
 0x1c2   :  { %209 = dma.vmem_to_hbm [thread:$0]  %s204_s30, 256, %s347_s4, [#allocation5], %s280_s11, %s280_s11, %s281_s12  }
 0x1c3   :  { %277 = dma.done.wait [#allocation5], 256  }
 0x1c4   :  { %278 = vsyncadd [#allocation5], 4294967040 }
 0x1c5   :  { %213 = vsyncpa [#allocation5], 1 }

</bundles_post_ra>
